<compile_context>
chip_gen: v5e
topology: v5e:2x2
jax: 0.10.0
libtpu: 0.0.40
codegen_flags: <defaults>
</compile_context>

<pallas_src>
import jax
import jax.numpy as jnp
from jax.experimental import pallas as pl
from jax.experimental.pallas import tpu as pltpu


_LANES = 128

# Set to jnp.bfloat16 to run the MXU at bf16 peak (f32 accumulation is kept
# either way and weights are cast once in the wrappers).  Default stays f32 so
# the strict 1e-4 check against the f32 reference holds.
_MM_DTYPE = jnp.float32


def _vmem_limit_bytes():
    """Per-generation scoped-VMEM budget (~3/4 of physical, capped at 96 MiB)."""
    try:
        cap = pltpu.get_tpu_info().vmem_capacity_bytes
    except Exception:
        cap = 128 * 1024 * 1024
    return int(min(96 * 1024 * 1024, (cap * 3) // 4))


_VMEM_LIMIT = _vmem_limit_bytes()


# ----------------------------- tiling helpers ------------------------------ #

def _round_up(x, m):
    return ((x + m - 1) // m) * m


def _pad_last(a, size):
    """Zero-pad the last axis of `a` to `size` (no-op if already that size)."""
    pad = size - a.shape[-1]
    if pad == 0:
        return a
    widths = [(0, 0)] * (a.ndim - 1) + [(0, pad)]
    return jnp.pad(a, widths)


def _tile_rows(m, row_elems, target_bytes=2 * 1024 * 1024):
    """Row (sublane) tile: ~target_bytes per input tile, >=2 steps if big.

    No wrapper-side padding: the last grid block may be ragged (Pallas masks
    the out-of-range rows on store; all row-wise kernels here are independent
    per row).  A single full-extent block is always layout-legal.
    """
    cap = max(8, (target_bytes // max(4 * row_elems, 1)) // 8 * 8)
    if m > cap:
        return cap
    if m >= 1024:              # enough work: split so both v7x TCs get a block
        return _round_up((m + 1) // 2, 8)
    return m                   # single full-extent block


# ------------------------------ Pallas kernels ----------------------------- #

def _bnrc1x1_kernel(x_ref, s_ref, b_ref, w_ref, o_ref):
    a = jnp.maximum(x_ref[...] * s_ref[...] + b_ref[...], 0.0)
    o_ref[...] = jnp.dot(a.astype(_MM_DTYPE), w_ref[...],
                         preferred_element_type=jnp.float32)


def _bnrc1x1_res_kernel(x_ref, s_ref, b_ref, w_ref, r_ref, o_ref):
    a = jnp.maximum(x_ref[...] * s_ref[...] + b_ref[...], 0.0)
    o_ref[...] = (jnp.dot(a.astype(_MM_DTYPE), w_ref[...],
                          preferred_element_type=jnp.float32)
                  + r_ref[...])


def bn_relu_conv1x1(x2d, scale, bias, w_io, residual=None):
    """Fused BN(folded)+ReLU+1x1conv[+residual add].

    x2d: (M, CPin) channel-padded activation.  w_io: (Cin, Cout) logical
    weights; zero-padded here to (CPin, CPout) so the output is lane-dense.
    Returns (M, CPout) f32.
    """
    M, CPin = x2d.shape
    Cin, Cout = w_io.shape
    CPout = _round_up(Cout, _LANES)
    w = jnp.zeros((CPin, CPout), _MM_DTYPE).at[:Cin, :Cout].set(
        w_io.astype(_MM_DTYPE))
    scale2 = _pad_last(scale.astype(jnp.float32), CPin).reshape(1, CPin)
    bias2 = _pad_last(bias.astype(jnp.float32), CPin).reshape(1, CPin)

    tm = _tile_rows(M, CPin)
    in_specs = [
        pl.BlockSpec((tm, CPin), lambda i: (i, 0)),
        pl.BlockSpec((1, CPin), lambda i: (0, 0)),      # grid-invariant
        pl.BlockSpec((1, CPin), lambda i: (0, 0)),      # grid-invariant
        pl.BlockSpec((CPin, CPout), lambda i: (0, 0)),  # weights loaded once
    ]
    args = [x2d, scale2, bias2, w]
    kernel = _bnrc1x1_kernel
    if residual is not None:
        in_specs.append(pl.BlockSpec((tm, CPout), lambda i: (i, 0)))
        args.append(residual)
        kernel = _bnrc1x1_res_kernel

    return pl.pallas_call(
        kernel,
        out_shape=jax.ShapeDtypeStruct((M, CPout), jnp.float32),
        grid=(pl.cdiv(M, tm),),
        in_specs=in_specs,
        out_specs=pl.BlockSpec((tm, CPout), lambda i: (i, 0)),
        compiler_params=pltpu.CompilerParams(
            dimension_semantics=("parallel",),
            vmem_limit_bytes=_VMEM_LIMIT),
    )(*args)


def _bnrc3x3_kernel(x_ref, s_ref, b_ref, w_ref, o_ref, pad_ref):
    _, H, W, Cin = x_ref.shape
    # Zero only the 1-px halo ring; the interior is fully overwritten below.
    # (Zeroing the whole scratch every step wastes the scarce vst slots, and a
    #  "zero once at program_id==0" scheme is unsafe under megacore splitting.)
    pad_ref[0:1, :, :] = jnp.zeros((1, W + 2, Cin), jnp.float32)
    pad_ref[H + 1:H + 2, :, :] = jnp.zeros((1, W + 2, Cin), jnp.float32)
    pad_ref[:, 0:1, :] = jnp.zeros((H + 2, 1, Cin), jnp.float32)
    pad_ref[:, W + 1:W + 2, :] = jnp.zeros((H + 2, 1, Cin), jnp.float32)
    # Fused BN+ReLU on the raw activation tile; padding is applied AFTER the
    # ReLU (matching Conv2d's zero padding of its input).
    a = jnp.maximum(x_ref[0] * s_ref[...] + b_ref[...], 0.0)      # (H, W, Cin)
    pad_ref[1:H + 1, 1:W + 1, :] = a
    # 9 taps read as VMEM slices and accumulated directly into the f32 output
    # block in VMEM (no live multi-vreg accumulator across the unrolled loop).
    for t in range(9):
        ky, kx = t // 3, t % 3
        xs = pad_ref[ky:ky + H, kx:kx + W, :].reshape(H * W, Cin)
        contrib = jnp.dot(xs.astype(_MM_DTYPE), w_ref[t],
                          preferred_element_type=jnp.float32)
        if t == 0:
            o_ref[0] = contrib
        else:
            o_ref[0] += contrib


def bn_relu_conv3x3(x_nhwc, scale, bias, w_oihw):
    """Fused BN(folded)+ReLU+3x3conv (stride=1, padding=1, dilation=1)."""
    N, H, W, CPin = x_nhwc.shape
    Cout, Cin = w_oihw.shape[:2]
    CPout = _round_up(Cout, _LANES)
    # (Cout, Cin, 3, 3) -> zero-padded (9, CPin, CPout); tap t = ky*3 + kx.
    w = jnp.zeros((CPout, CPin, 3, 3), _MM_DTYPE).at[:Cout, :Cin].set(
        w_oihw.astype(_MM_DTYPE))
    w_taps = jnp.transpose(w, (2, 3, 1, 0)).reshape(9, CPin, CPout)
    scale3 = _pad_last(scale.astype(jnp.float32), CPin).reshape(1, 1, CPin)
    bias3 = _pad_last(bias.astype(jnp.float32), CPin).reshape(1, 1, CPin)

    out = pl.pallas_call(
        _bnrc3x3_kernel,
        out_shape=jax.ShapeDtypeStruct((N, H * W, CPout), jnp.float32),
        grid=(N,),
        in_specs=[
            pl.BlockSpec((1, H, W, CPin), lambda n: (n, 0, 0, 0)),
            pl.BlockSpec((1, 1, CPin), lambda n: (0, 0, 0)),
            pl.BlockSpec((1, 1, CPin), lambda n: (0, 0, 0)),
            pl.BlockSpec((9, CPin, CPout), lambda n: (0, 0, 0)),  # loaded once
        ],
        out_specs=pl.BlockSpec((1, H * W, CPout), lambda n: (n, 0, 0)),
        scratch_shapes=[pltpu.VMEM((H + 2, W + 2, CPin), jnp.float32)],
        compiler_params=pltpu.CompilerParams(
            dimension_semantics=("parallel",),
            vmem_limit_bytes=_VMEM_LIMIT),
    )(x_nhwc, scale3, bias3, w_taps)
    return out.reshape(N, H, W, CPout)


def _maxpool_kernel(x_ref, o_ref):
    v = x_ref[...]                                           # (tm, 2, Wo, 2, C)
    m = jnp.maximum(v[:, 0], v[:, 1])                        # (tm, Wo, 2, C)
    o_ref[...] = jnp.maximum(m[:, :, 0, :], m[:, :, 1, :])   # (tm, Wo, C)


def maxpool2x2(x_nhwc):
    """Fused 2x2/2 max-pool: one HBM read of x (free 5-D reshape), lane-dense out."""
    N, H, W, C = x_nhwc.shape
    Ho, Wo = H // 2, W // 2   # odd H/W are floored, matching nn.MaxPool2d(2, 2)
    M = N * Ho
    x5 = x_nhwc[:, :Ho * 2, :Wo * 2, :].reshape(M, 2, Wo, 2, C)  # pure reshape
    tm = _tile_rows(M, 2 * Wo * 2 * C)
    out = pl.pallas_call(
        _maxpool_kernel,
        out_shape=jax.ShapeDtypeStruct((M, Wo, C), jnp.float32),
        grid=(pl.cdiv(M, tm),),
        in_specs=[pl.BlockSpec((tm, 2, Wo, 2, C), lambda i: (i, 0, 0, 0, 0))],
        out_specs=pl.BlockSpec((tm, Wo, C), lambda i: (i, 0, 0)),
        compiler_params=pltpu.CompilerParams(
            dimension_semantics=("parallel",),
            vmem_limit_bytes=_VMEM_LIMIT),
    )(x5)
    return out.reshape(N, Ho, Wo, C)


# --------------------------- module-level forward --------------------------- #

def resblock_forward(x_nhwc, layer_params, shortcut_params=None, shortcut_stride=1):
    N, H, W, CP = x_nhwc.shape
    p0, p1, p2 = layer_params
    mid_c = p0["w"].shape[0]
    out_c = p2["w"].shape[0]
    CPmid = _round_up(mid_c, _LANES)
    CPout = _round_up(out_c, _LANES)

    # Shortcut branch first so it can be fused (as the residual add) into the
    # last 1x1 conv of the main branch.
    # TODO(synk): the fused residual assumes the shortcut keeps the main
    #             branch's spatial size (shortcut_stride == 1), as in DownStage.
    if shortcut_params is None:
        res2d = x_nhwc.reshape(N * H * W, CP)          # CP == CPout here
    else:
        xs = x_nhwc[:, ::shortcut_stride, ::shortcut_stride, :]
        Ns, Hs, Ws, _ = xs.shape
        res2d = bn_relu_conv1x1(xs.reshape(Ns * Hs * Ws, CP),
                                shortcut_params["scale"], shortcut_params["bias"],
                                shortcut_params["w"][:, :, 0, 0].T)

    # layer 0: 1x1 (BN+ReLU fused into the matmul)
    y = bn_relu_conv1x1(x_nhwc.reshape(N * H * W, CP),
                        p0["scale"], p0["bias"],
                        p0["w"][:, :, 0, 0].T).reshape(N, H, W, CPmid)
    # layer 1: 3x3, stride=1, padding=1 (fully fused, taps sliced in VMEM)
    y = bn_relu_conv3x3(y, p1["scale"], p1["bias"], p1["w"])
    # layer 2: 1x1 with the residual add fused into the same kernel
    out = bn_relu_conv1x1(y.reshape(N * H * W, CPmid),
                          p2["scale"], p2["bias"],
                          p2["w"][:, :, 0, 0].T,
                          residual=res2d)
    return out.reshape(N, H, W, CPout)


def down_stage_forward(x_nchw, params):
    x = jnp.transpose(x_nchw, (0, 2, 3, 1)).astype(jnp.float32)  # NCHW -> NHWC
    in_c = x.shape[-1]
    out_c = params["blocks"][0]["layers"][2]["w"].shape[0]
    # Pad the channel axis ONCE to a multiple of 128 so every kernel stores
    # lane-dense blocks; the padded channels stay exactly zero throughout.
    x = _pad_last(x, _round_up(in_c, _LANES))

    blk0 = params["blocks"][0]
    y = resblock_forward(x, blk0["layers"], blk0["shortcut"], params["stride"])
    for blk in params["blocks"][1:]:
        y = resblock_forward(y, blk["layers"], None)
    y = maxpool2x2(y)
    y = y[..., :out_c]                      # drop the channel padding
    return jnp.transpose(y, (0, 3, 1, 2))   # back to NCHW


# ------------------------------ parameter init ------------------------------ #

def init_bn_relu_conv(key, in_c, out_c, ksize):
    k1, k2, k3, k4, k5 = jax.random.split(key, 5)
    gamma = jax.random.uniform(k1, (in_c,), minval=0.5, maxval=1.5)
    beta = jax.random.normal(k2, (in_c,)) * 0.1
    mean = jax.random.normal(k3, (in_c,)) * 0.1
    var = jax.random.uniform(k4, (in_c,), minval=0.5, maxval=1.5)
    w = jax.random.normal(k5, (out_c, in_c, ksize, ksize)) / jnp.sqrt(in_c * ksize * ksize)
    eps = 1e-5
    scale = gamma / jnp.sqrt(var + eps)
    bias = beta - mean * scale
    return {"scale": scale.astype(jnp.float32),
            "bias": bias.astype(jnp.float32),
            "w": w.astype(jnp.float32)}


def init_down_stage(key, in_c, out_c, num_blk, stride=1):
    mid_c = out_c // 4
    keys = jax.random.split(key, num_blk + 1)
    shortcut = init_bn_relu_conv(keys[0], in_c, out_c, 1)
    k0 = jax.random.split(keys[1], 3)
    blocks = [{"layers": [init_bn_relu_conv(k0[0], in_c, mid_c, 1),
                          init_bn_relu_conv(k0[1], mid_c, mid_c, 3),
                          init_bn_relu_conv(k0[2], mid_c, out_c, 1)],
               "shortcut": shortcut}]
    for b in range(1, num_blk):
        kb = jax.random.split(keys[b + 1], 3)
        blocks.append({"layers": [init_bn_relu_conv(kb[0], out_c, mid_c, 1),
                                  init_bn_relu_conv(kb[1], mid_c, mid_c, 3),
                                  init_bn_relu_conv(kb[2], mid_c, out_c, 1)],
                       "shortcut": None})
    return {"blocks": blocks, "stride": stride}


# ------------------------- pure-JAX reference check ------------------------- #

def _ref_bn_relu_conv(x_nchw, p, stride=1, padding=0):
    a = jnp.maximum(x_nchw * p["scale"].reshape(1, -1, 1, 1)
                    + p["bias"].reshape(1, -1, 1, 1), 0.0)
    return jax.lax.conv_general_dilated(
        a, p["w"], window_strides=(stride, stride),
        padding=((padding, padding), (padding, padding)),
        dimension_numbers=("NCHW", "OIHW", "NCHW"))


def _ref_down_stage(x_nchw, params):
    def resblock(x, blk, stride):
        y = _ref_bn_relu_conv(x, blk["layers"][0])
        y = _ref_bn_relu_conv(y, blk["layers"][1], padding=1)
        y = _ref_bn_relu_conv(y, blk["layers"][2])
        s = x if blk["shortcut"] is None else _ref_bn_relu_conv(x, blk["shortcut"], stride=stride)
        return y + s

    y = resblock(x_nchw, params["blocks"][0], params["stride"])
    for blk in params["blocks"][1:]:
        y = resblock(y, blk, 1)
    return jax.lax.reduce_window(y, -jnp.inf, jax.lax.max,
                                 (1, 1, 2, 2), (1, 1, 2, 2), "VALID")


# ----------------------------------- main ----------------------------------- #

if __name__ == "__main__":
    key = jax.random.PRNGKey(0)
    k_x, k_p = jax.random.split(key)

    N, in_c, H, W = 2, 4, 16, 16
    out_c, num_blk, stride = 16, 2, 1

    x = jax.random.normal(k_x, (N, in_c, H, W), dtype=jnp.float32)  # NCHW like PyTorch
    params = init_down_stage(k_p, in_c, out_c, num_blk, stride)

    out = down_stage_forward(x, params)
    out = jax.block_until_ready(out)

    assert out.shape == (N, out_c, H // 2, W // 2), out.shape

    ref = jax.block_until_ready(_ref_down_stage(x, params))
    assert jnp.allclose(out, ref, rtol=1e-4, atol=1e-4), float(jnp.max(jnp.abs(out - ref)))

    print("KERNEL_OK")
</pallas_src>

<mosaic_0001>
module attributes {stable_mosaic.version = 11 : i64} {
  func.func @_bnrc1x1_kernel(%arg0: i32, %arg1: memref<512x128xf32, #tpu.memory_space<vmem>>, %arg2: memref<1x128xf32, #tpu.memory_space<vmem>>, %arg3: memref<1x128xf32, #tpu.memory_space<vmem>>, %arg4: memref<128x128xf32, #tpu.memory_space<vmem>>, %arg5: memref<512x128xf32, #tpu.memory_space<vmem>>) attributes {dimension_semantics = [#tpu.dimension_semantics<parallel>], iteration_bounds = array<i64: 1>, scalar_prefetch = 0 : i64, scratch_operands = 0 : i64, tpu.core_type = #tpu.core_type<tc>, window_params = [{transform_indices = @transform_0, window_bounds = array<i64: 512, 128>}, {pipeline_mode = #tpu.pipeline_mode<synchronous>, transform_indices = @transform_1, window_bounds = array<i64: 1, 128>}, {pipeline_mode = #tpu.pipeline_mode<synchronous>, transform_indices = @transform_2, window_bounds = array<i64: 1, 128>}, {pipeline_mode = #tpu.pipeline_mode<synchronous>, transform_indices = @transform_3, window_bounds = array<i64: 128, 128>}, {transform_indices = @transform_4, window_bounds = array<i64: 512, 128>}]} {
    %c0 = arith.constant 0 : index
    %c0_0 = arith.constant 0 : index
    %0 = vector.load %arg1[%c0, %c0_0] : memref<512x128xf32, #tpu.memory_space<vmem>>, vector<512x128xf32>
    %c0_1 = arith.constant 0 : index
    %c0_2 = arith.constant 0 : index
    %1 = vector.load %arg2[%c0_1, %c0_2] : memref<1x128xf32, #tpu.memory_space<vmem>>, vector<1x128xf32>
    %2 = vector.broadcast %1 : vector<1x128xf32> to vector<512x128xf32>
    %3 = arith.mulf %0, %2 : vector<512x128xf32>
    %c0_3 = arith.constant 0 : index
    %c0_4 = arith.constant 0 : index
    %4 = vector.load %arg3[%c0_3, %c0_4] : memref<1x128xf32, #tpu.memory_space<vmem>>, vector<1x128xf32>
    %5 = vector.broadcast %4 : vector<1x128xf32> to vector<512x128xf32>
    %6 = arith.addf %3, %5 : vector<512x128xf32>
    %cst = arith.constant 0.000000e+00 : f32
    %7 = vector.broadcast %cst : f32 to vector<512x128xf32>
    %8 = arith.maximumf %6, %7 : vector<512x128xf32>
    %c0_5 = arith.constant 0 : index
    %c0_6 = arith.constant 0 : index
    %9 = vector.load %arg4[%c0_5, %c0_6] : memref<128x128xf32, #tpu.memory_space<vmem>>, vector<128x128xf32>
    %cst_7 = arith.constant dense<0.000000e+00> : vector<512x128xf32>
    %10 = tpu.matmul %8, %9, %cst_7 {dimension_numbers = #tpu.dot_dimension_numbers<[1], [0], [0], [1], [0, 0, 1, 1], [], []>} : vector<512x128xf32>, vector<128x128xf32>, vector<512x128xf32> -> vector<512x128xf32>
    %c0_8 = arith.constant 0 : index
    %c0_9 = arith.constant 0 : index
    %11 = vector.load %arg5[%c0_8, %c0_9] : memref<512x128xf32, #tpu.memory_space<vmem>>, vector<512x128xf32>
    tpu.vector_store %arg5[%c0_8, %c0_9], %10 {strides = array<i32>} : memref<512x128xf32, #tpu.memory_space<vmem>>, vector<512x128xf32>,
    return
  }
  func.func @transform_0(%arg0: i32) -> (i32, i32) {
    %c0_i32 = arith.constant 0 : i32
    %c0_i32_0 = arith.constant 0 : i32
    return %arg0, %c0_i32 : i32, i32
  }
  func.func @transform_1(%arg0: i32) -> (i32, i32) {
    %c0_i32 = arith.constant 0 : i32
    %c0_i32_0 = arith.constant 0 : i32
    %c0_i32_1 = arith.constant 0 : i32
    return %c0_i32, %c0_i32_0 : i32, i32
  }
  func.func @transform_2(%arg0: i32) -> (i32, i32) {
    %c0_i32 = arith.constant 0 : i32
    %c0_i32_0 = arith.constant 0 : i32
    %c0_i32_1 = arith.constant 0 : i32
    return %c0_i32, %c0_i32_0 : i32, i32
  }
  func.func @transform_3(%arg0: i32) -> (i32, i32) {
    %c0_i32 = arith.constant 0 : i32
    %c0_i32_0 = arith.constant 0 : i32
    %c0_i32_1 = arith.constant 0 : i32
    return %c0_i32, %c0_i32_0 : i32, i32
  }
  func.func @transform_4(%arg0: i32) -> (i32, i32) {
    %c0_i32 = arith.constant 0 : i32
    %c0_i32_0 = arith.constant 0 : i32
    return %arg0, %c0_i32 : i32, i32
  }
}

</mosaic_0001>

<bundles_post_ra>
// kernel: tpu_custom_call.1
= control target key start
LH: loop header
LB: loop body
LE: loop exit
PB: predicated region body
PF: predicated region fallthrough
CT: control target
= control target key end

     0   :  { %9 = vsyncpa [#allocation3], 0  ;;  %s981_s0 = inlined_call_operand.hbm [shape: f32[512,128], index: 0, kind: input, shape index: {}]   ;;  %s982_s1 = inlined_call_operand.hbm [shape: f32[1,128], index: 1, kind: input, shape index: {}]   ;;  %s983_s2 = inlined_call_operand.vmem [shape: f32[1,128], index: 2, kind: input, shape index: {}]   ;;  %s984_s3 = inlined_call_operand.hbm [shape: f32[128,128], index: 3, kind: input, shape index: {}]   ;;  %s985_s4 = inlined_call_operand.hbm [shape: f32[512,128], index: 4, kind: output, shape index: {}]  }
   0x1   :  { %10 = vsyncpa [#allocation6], 0  ;;  %s30_s17 = sshll.u32 %s982_s1, 4  ;;  %s31_s17 = int_to_ptr.hbm [resolvable:$true] %s30_s17 }
   0x2   :  { %11 = vsyncpa [#allocation4], 0  ;;  %s794_s18 = smov [#allocation5]   ;;  %s16_s22 = sshll.u32 %s981_s0, 4  ;;  %s17_s22 = int_to_ptr.hbm [resolvable:$true] %s16_s22 }
   0x3   :  { %s32_s19 = sshll.u32 %s794_s18, 4  ;;  %s795_s23 = smov [#allocation2]   ;;  %s33_s19 = int_to_ptr.vmem [resolvable:$true] %s32_s19 }
   0x4   :  { %35 = dma.hbm_to_vmem [thread:$0]  %s31_s17, 16, %s33_s19, [#allocation6]  }
   0x5   :  { %s18_s24 = sshll.u32 %s795_s23, 4  ;;  %s796_s25 = smov 128   ;;  %s19_s24 = int_to_ptr.vmem [resolvable:$true] %s18_s24 }
   0x6   :  { %s797_s26 = smov 8   ;;  %s42_s28 = sshll.u32 %s984_s3, 4  ;;  %s43_s28 = int_to_ptr.hbm [resolvable:$true] %s42_s28 }
   0x7   :  { %24 = dma.hbm_to_vmem [thread:$0]  %s17_s22, 8192, %s19_s24, [#allocation3], %s796_s25, %s796_s25, %s797_s26  }
   0x8   :  { %s798_s29 = smov [#allocation7]  }
   0x9   :  { %s44_s30 = sshll.u32 %s798_s29, 4  ;;  %s45_s30 = int_to_ptr.vmem [resolvable:$true] %s44_s30 }
   0xa   :  { %50 = dma.hbm_to_vmem [thread:$0]  %s43_s28, 2048, %s45_s30, [#allocation6], %s796_s25, %s796_s25, %s797_s26  }
   0xb   :  { %788 = dma.done.wait [#allocation3], 8192  }
   0xc   :  { %789 = vsyncadd [#allocation3], 4294959104 }
   0xd   :  { %790 = dma.done.wait [#allocation6], 2064  }
   0xe   :  { %791 = vsyncadd [#allocation6], 4294965232  ;;  %v342_v0 = vld [vmem:[#allocation7 + $0x78] sm:$0xff]  ;;  %v341_v1 = vld [vmem:[#allocation7 + $0x70] sm:$0xff]  ;;  %s622_s8 = sshll.u32 %s985_s4, 4  ;;  %s623_s8 = int_to_ptr.hbm [resolvable:$true] %s622_s8 }
   0xf   :  { %637 = vmatpush.msra.mxu2 %v342_v0  ;;  %638 = vmatpush.msra.mxu3 %v342_v0  ;;  %v340_v2 = vld [vmem:[#allocation7 + $0x68] sm:$0xff]  ;;  %v339_v3 = vld [vmem:[#allocation7 + $0x60] sm:$0xff]  ;;  %v338_v4 = vld [vmem:[#allocation7 + $0x58] sm:$0xff] }
  0x10   :  { %343 = vmatpush.msra.mxu0 %v342_v0  ;;  %636 = vmatpush.msra.mxu1 %v342_v0  ;;  %v337_v5 = vld [vmem:[#allocation7 + $0x50] sm:$0xff]  ;;  %v336_v6 = vld [vmem:[#allocation7 + $0x48] sm:$0xff]  ;;  %v335_v7 = vld [vmem:[#allocation7 + $0x40] sm:$0xff] }
  0x11   :  { %640 = vmatpush.msra.mxu2 %v341_v1  ;;  %641 = vmatpush.msra.mxu3 %v341_v1  ;;  %v334_v8 = vld [vmem:[#allocation7 + $0x38] sm:$0xff]  ;;  %v333_v9 = vld [vmem:[#allocation7 + $0x30] sm:$0xff]  ;;  %v332_v13 = vld [vmem:[#allocation7 + $0x28] sm:$0xff] }
  0x12   :  { %344 = vmatpush.msra.mxu0 %v341_v1  ;;  %639 = vmatpush.msra.mxu1 %v341_v1  ;;  %v840_v10 = vld [vmem:[#allocation5] ss:$0 sm:$0xff]  ;;  %v331_v16 = vld [vmem:[#allocation7 + $0x20] sm:$0xff]  ;;  %v329_v23 = vld [vmem:[#allocation7 + $0x10] sm:$0xff] }
  0x13   :  { %643 = vmatpush.msra.mxu2 %v340_v2  ;;  %644 = vmatpush.msra.mxu3 %v340_v2  ;;  %v95_v11 = vld [vmem:[#allocation2 + $0x100] sm:$0xff]  ;;  %v96_v26 = vld [vmem:[#allocation2 + $0x108] sm:$0xff]  ;;  %v97_v44 = vld [vmem:[#allocation2 + $0x110] sm:$0xff] }
  0x14   :  { %345 = vmatpush.msra.mxu0 %v340_v2  ;;  %642 = vmatpush.msra.mxu1 %v340_v2  ;;  %v111_v12 = vld [vmem:[#allocation2 + $0x180] sm:$0xff]  ;;  %v163_v17 = vmul.f32 %v840_v10, %v95_v11  ;;  %v112_v27 = vld [vmem:[#allocation2 + $0x188] sm:$0xff]  ;;  %v164_v36 = vmul.f32 %v840_v10, %v96_v26  ;;  %v113_v45 = vld [vmem:[#allocation2 + $0x190] sm:$0xff]  ;;  %v165_v52 = vmul.f32 %v840_v10, %v97_v44 }
  0x15   :  { %646 = vmatpush.msra.mxu2 %v339_v3  ;;  %647 = vmatpush.msra.mxu3 %v339_v3  ;;  %v63_v14 = vld [vmem:[#allocation2] sm:$0xff]  ;;  %v179_v19 = vmul.f32 %v840_v10, %v111_v12  ;;  %v328_v28 = vld [vmem:[#allocation7 + $0x8] sm:$0xff]  ;;  %v180_v37 = vmul.f32 %v840_v10, %v112_v27  ;;  %v181_v53 = vmul.f32 %v840_v10, %v113_v45  ;;  %v98_v60 = vld [vmem:[#allocation2 + $0x118] sm:$0xff] }
  0x16   :  { %346 = vmatpush.msra.mxu0 %v339_v3  ;;  %645 = vmatpush.msra.mxu1 %v339_v3  ;;  %v79_v15 = vld [vmem:[#allocation2 + $0x80] sm:$0xff]  ;;  %v131_v21 = vmul.f32 %v840_v10, %v63_v14  ;;  %v64_v31 = vld [vmem:[#allocation2 + $0x8] sm:$0xff]  ;;  %v65_v48 = vld [vmem:[#allocation2 + $0x10] sm:$0xff] }
  0x17   :  { %649 = vmatpush.msra.mxu2 %v338_v4  ;;  %650 = vmatpush.msra.mxu3 %v338_v4  ;;  %v846_v18 = vld [vmem:[%s983_s2] ss:$0 sm:$0xff]  ;;  %v147_v22 = vmul.f32 %v840_v10, %v79_v15  ;;  %v80_v32 = vld [vmem:[#allocation2 + $0x88] sm:$0xff]  ;;  %v132_v40 = vmul.f32 %v840_v10, %v64_v31  ;;  %v81_v49 = vld [vmem:[#allocation2 + $0x90] sm:$0xff]  ;;  %v133_v56 = vmul.f32 %v840_v10, %v65_v48  ;;  %s799_s2 = smov [#allocation8]  }
  0x18   :  { %347 = vmatpush.msra.mxu0 %v338_v4  ;;  %648 = vmatpush.msra.mxu1 %v338_v4  ;;  %v330_v20 = vld [vmem:[#allocation7 + $0x18] sm:$0xff]  ;;  %v231_v24 = vadd.f32 %v846_v18, %v163_v17  ;;  %v247_v25 = vadd.f32 %v846_v18, %v179_v19  ;;  %v199_v29 = vadd.f32 %v846_v18, %v131_v21  ;;  %v327_v33 = vld [vmem:[#allocation7] sm:$0xff]  ;;  %s620_s5 = sshll.u32 %s799_s2, 4  ;;  %s621_s5 = int_to_ptr.vmem [resolvable:$true] %s620_s5 }
  0x19   :  { %652 = vmatpush.msra.mxu2 %v337_v5  ;;  %653 = vmatpush.msra.mxu3 %v337_v5  ;;  %v215_v30 = vadd.f32 %v846_v18, %v147_v22  ;;  %v148_v41 = vmul.f32 %v840_v10, %v80_v32  ;;  %v232_v42 = vadd.f32 %v846_v18, %v164_v36  ;;  %v114_v61 = vld [vmem:[#allocation2 + $0x198] sm:$0xff]  ;;  %v115_v14 = vld [vmem:[#allocation2 + $0x1a0] sm:$0xff]  ;;  %v116_v31 = vld [vmem:[#allocation2 + $0x1a8] sm:$0xff] }
  0x1a   :  { %348 = vmatpush.msra.mxu0 %v337_v5  ;;  %651 = vmatpush.msra.mxu1 %v337_v5  ;;  %v295_v34 = vmax.f32 %v231_v24, 0.0  ;;  %v311_v35 = vmax.f32 %v247_v25, 0.0  ;;  %v263_v38 = vmax.f32 %v199_v29, 0.0  ;;  %v248_v43 = vadd.f32 %v846_v18, %v180_v37  ;;  %v66_v0 = vld [vmem:[#allocation2 + $0x18] sm:$0xff]  ;;  %v67_v17 = vld [vmem:[#allocation2 + $0x20] sm:$0xff] }
  0x1b   :  { %655 = vmatpush.msra.mxu2 %v336_v6  ;;  %656 = vmatpush.msra.mxu3 %v336_v6  ;;  %v279_v39 = vmax.f32 %v215_v30, 0.0  ;;  %v200_v46 = vadd.f32 %v846_v18, %v132_v40  ;;  %v216_v47 = vadd.f32 %v846_v18, %v148_v41  ;;  %v296_v50 = vmax.f32 %v232_v42, 0.0  ;;  %v82_v1 = vld [vmem:[#allocation2 + $0x98] sm:$0xff]  ;;  %v83_v19 = vld [vmem:[#allocation2 + $0xa0] sm:$0xff]  ;;  %v100_v30 = vld [vmem:[#allocation2 + $0x128] sm:$0xff] }
  0x1c   :  { %349 = vmatpush.msra.mxu0 %v336_v6  ;;  %654 = vmatpush.msra.mxu1 %v336_v6  ;;  %v312_v51 = vmax.f32 %v248_v43, 0.0  ;;  %v149_v57 = vmul.f32 %v840_v10, %v81_v49  ;;  %v233_v58 = vadd.f32 %v846_v18, %v165_v52  ;;  %v249_v59 = vadd.f32 %v846_v18, %v181_v53 }
  0x1d   :  { %658 = vmatpush.msra.mxu2 %v335_v7  ;;  %659 = vmatpush.msra.mxu3 %v335_v7  ;;  %v264_v54 = vmax.f32 %v200_v46, 0.0  ;;  %v280_v55 = vmax.f32 %v216_v47, 0.0  ;;  %v201_v62 = vadd.f32 %v846_v18, %v133_v56  ;;  %v166_v4 = vmul.f32 %v840_v10, %v98_v60  ;;  %v101_v46 = vld [vmem:[#allocation2 + $0x130] sm:$0xff] }
  0x1e   :  { %350 = vmatpush.msra.mxu0 %v335_v7  ;;  %657 = vmatpush.msra.mxu1 %v335_v7  ;;  %v217_v63 = vadd.f32 %v846_v18, %v149_v57  ;;  %v297_v2 = vmax.f32 %v233_v58, 0.0  ;;  %v313_v3 = vmax.f32 %v249_v59, 0.0  ;;  %v182_v5 = vmul.f32 %v840_v10, %v114_v61  ;;  %v117_v47 = vld [vmem:[#allocation2 + $0x1b0] sm:$0xff] }
  0x1f   :  { %661 = vmatpush.msra.mxu2 %v334_v8  ;;  %662 = vmatpush.msra.mxu3 %v334_v8  ;;  %v265_v6 = vmax.f32 %v201_v62, 0.0  ;;  %v234_v11 = vadd.f32 %v846_v18, %v166_v4  ;;  %v135_v26 = vmul.f32 %v840_v10, %v67_v17  ;;  %v151_v27 = vmul.f32 %v840_v10, %v83_v19  ;;  %v102_v62 = vld [vmem:[#allocation2 + $0x138] sm:$0xff] }
  0x20   :  { %351 = vmatpush.msra.mxu0 %v334_v8  ;;  %660 = vmatpush.msra.mxu1 %v334_v8  ;;  %v281_v7 = vmax.f32 %v217_v63, 0.0  ;;  %v134_v8 = vmul.f32 %v840_v10, %v66_v0  ;;  %v250_v12 = vadd.f32 %v846_v18, %v182_v5  ;;  %v118_v63 = vld [vmem:[#allocation2 + $0x1b8] sm:$0xff] }
  0x21   :  { %664 = vmatpush.msra.mxu2 %v333_v9  ;;  %665 = vmatpush.msra.mxu3 %v333_v9  ;;  %v203_v32 = vadd.f32 %v846_v18, %v135_v26 }
  0x22   :  { %352 = vmatpush.msra.mxu0 %v333_v9  ;;  %663 = vmatpush.msra.mxu1 %v333_v9  ;;  %v150_v9 = vmul.f32 %v840_v10, %v82_v1  ;;  %v202_v15 = vadd.f32 %v846_v18, %v134_v8  ;;  %v314_v21 = vmax.f32 %v250_v12, 0.0 }
  0x23   :  { %667 = vmatpush.msra.mxu2 %v332_v13  ;;  %668 = vmatpush.msra.mxu3 %v332_v13  ;;  %v267_v40 = vmax.f32 %v203_v32, 0.0  ;;  %v104_v32 = vld [vmem:[#allocation2 + $0x148] sm:$0xff] }
  0x24   :  { %353 = vmatpush.msra.mxu0 %v332_v13  ;;  %666 = vmatpush.msra.mxu1 %v332_v13  ;;  %v99_v13 = vld [vmem:[#allocation2 + $0x120] sm:$0xff]  ;;  %v266_v24 = vmax.f32 %v202_v15, 0.0 }
  0x25   :  { %670 = vmatpush.msra.mxu2 %v331_v16  ;;  %671 = vmatpush.msra.mxu3 %v331_v16  ;;  %v167_v22 = vmul.f32 %v840_v10, %v99_v13  ;;  %v103_v15 = vld [vmem:[#allocation2 + $0x140] sm:$0xff] }
  0x26   :  { %354 = vmatpush.msra.mxu0 %v331_v16  ;;  %669 = vmatpush.msra.mxu1 %v331_v16  ;;  %v218_v16 = vadd.f32 %v846_v18, %v150_v9 }
  0x27   :  { %673 = vmatpush.msra.mxu2 %v330_v20  ;;  %674 = vmatpush.msra.mxu3 %v330_v20 }
  0x28   :  { %355 = vmatpush.msra.mxu0 %v330_v20  ;;  %672 = vmatpush.msra.mxu1 %v330_v20  ;;  %v298_v20 = vmax.f32 %v234_v11, 0.0  ;;  %v282_v25 = vmax.f32 %v218_v16, 0.0  ;;  %v119_v16 = vld [vmem:[#allocation2 + $0x1c0] sm:$0xff] }
  0x29   :  { %676 = vmatpush.msra.mxu2 %v329_v23  ;;  %677 = vmatpush.msra.mxu3 %v329_v23 }
  0x2a   :  { %356 = vmatpush.msra.mxu0 %v329_v23  ;;  %675 = vmatpush.msra.mxu1 %v329_v23  ;;  %v183_v23 = vmul.f32 %v840_v10, %v115_v14 }
  0x2b   :  { %679 = vmatpush.msra.mxu2 %v328_v28  ;;  %680 = vmatpush.msra.mxu3 %v328_v28 }
  0x2c   :  { %357 = vmatpush.msra.mxu0 %v328_v28  ;;  %678 = vmatpush.msra.mxu1 %v328_v28  ;;  %v235_v28 = vadd.f32 %v846_v18, %v167_v22  ;;  %v251_v29 = vadd.f32 %v846_v18, %v183_v23 }
  0x2d   :  { %682 = vmatpush.msra.mxu2 %v327_v33  ;;  %683 = vmatpush.msra.mxu3 %v327_v33 }
  0x2e   :  { %455 = vmatmul.f32.vlgmr.msra.gmra.mxu2 %v295_v34  ;;  %503 = vmatmul.f32.vlgmr.msra.gmra.mxu3 %v311_v35  ;;  %v68_v34 = vld [vmem:[#allocation2 + $0x28] sm:$0xff]  ;;  %v299_v36 = vmax.f32 %v235_v28, 0.0  ;;  %v315_v37 = vmax.f32 %v251_v29, 0.0 }
  0x2f   :  { %358 = vmatpush.msra.mxu0 %v327_v33  ;;  %681 = vmatpush.msra.mxu1 %v327_v33  ;;  %v219_v33 = vadd.f32 %v846_v18, %v151_v27  ;;  %v84_v35 = vld [vmem:[#allocation2 + $0xa8] sm:$0xff]  ;;  %v136_v42 = vmul.f32 %v840_v10, %v68_v34 }
  0x30   :  { %359 = vmatmul.f32.vlgmr.msra.gmra.mxu0 %v263_v38  ;;  %407 = vmatmul.f32.vlgmr.msra.gmra.mxu1 %v279_v39  ;;  %v168_v38 = vmul.f32 %v840_v10, %v100_v30  ;;  %v184_v39 = vmul.f32 %v840_v10, %v116_v31  ;;  %v152_v43 = vmul.f32 %v840_v10, %v84_v35 }
  0x31   :  { %v283_v41 = vmax.f32 %v219_v33, 0.0  ;;  %v204_v48 = vadd.f32 %v846_v18, %v136_v42  ;;  %v120_v33 = vld [vmem:[#allocation2 + $0x1c8] sm:$0xff] }
  0x32   :  { %v236_v44 = vadd.f32 %v846_v18, %v168_v38  ;;  %v252_v45 = vadd.f32 %v846_v18, %v184_v39  ;;  %v220_v49 = vadd.f32 %v846_v18, %v152_v43 }
  0x33   :  { %v268_v56 = vmax.f32 %v204_v48, 0.0  ;;  %v105_v48 = vld [vmem:[#allocation2 + $0x150] sm:$0xff] }
  0x34   :  { %v300_v52 = vmax.f32 %v236_v44, 0.0  ;;  %v316_v53 = vmax.f32 %v252_v45, 0.0  ;;  %v284_v57 = vmax.f32 %v220_v49, 0.0  ;;  %v121_v49 = vld [vmem:[#allocation2 + $0x1d0] sm:$0xff] }
  0x36   :  { %458 = vmatmul.f32.gmra.mxu2 %v296_v50  ;;  %506 = vmatmul.f32.gmra.mxu3 %v312_v51  ;;  %v69_v50 = vld [vmem:[#allocation2 + $0x30] sm:$0xff] }
  0x37   :  { %v85_v51 = vld [vmem:[#allocation2 + $0xb0] sm:$0xff]  ;;  %v137_v58 = vmul.f32 %v840_v10, %v69_v50 }
  0x38   :  { %362 = vmatmul.f32.gmra.mxu0 %v264_v54  ;;  %410 = vmatmul.f32.gmra.mxu1 %v280_v55  ;;  %v169_v54 = vmul.f32 %v840_v10, %v101_v46  ;;  %v185_v55 = vmul.f32 %v840_v10, %v117_v47  ;;  %v153_v59 = vmul.f32 %v840_v10, %v85_v51 }
  0x39   :  { %v205_v0 = vadd.f32 %v846_v18, %v137_v58 }
  0x3a   :  { %v237_v60 = vadd.f32 %v846_v18, %v169_v54  ;;  %v253_v61 = vadd.f32 %v846_v18, %v185_v55  ;;  %v221_v1 = vadd.f32 %v846_v18, %v153_v59 }
  0x3b   :  { %v269_v8 = vmax.f32 %v205_v0, 0.0  ;;  %v106_v0 = vld [vmem:[#allocation2 + $0x158] sm:$0xff] }
  0x3c   :  { %v301_v4 = vmax.f32 %v237_v60, 0.0  ;;  %v317_v5 = vmax.f32 %v253_v61, 0.0  ;;  %v285_v9 = vmax.f32 %v221_v1, 0.0  ;;  %v122_v1 = vld [vmem:[#allocation2 + $0x1d8] sm:$0xff] }
  0x3e   :  { %461 = vmatmul.f32.gmra.mxu2 %v297_v2  ;;  %509 = vmatmul.f32.gmra.mxu3 %v313_v3  ;;  %v70_v2 = vld [vmem:[#allocation2 + $0x38] sm:$0xff] }
  0x3f   :  { %v86_v3 = vld [vmem:[#allocation2 + $0xb8] sm:$0xff]  ;;  %v138_v11 = vmul.f32 %v840_v10, %v70_v2 }
  0x40   :  { %365 = vmatmul.f32.gmra.mxu0 %v265_v6  ;;  %413 = vmatmul.f32.gmra.mxu1 %v281_v7  ;;  %v170_v6 = vmul.f32 %v840_v10, %v102_v62  ;;  %v186_v7 = vmul.f32 %v840_v10, %v118_v63  ;;  %v154_v12 = vmul.f32 %v840_v10, %v86_v3 }
  0x41   :  { %v206_v17 = vadd.f32 %v846_v18, %v138_v11 }
  0x42   :  { %v238_v13 = vadd.f32 %v846_v18, %v170_v6  ;;  %v254_v14 = vadd.f32 %v846_v18, %v186_v7  ;;  %v222_v19 = vadd.f32 %v846_v18, %v154_v12 }
  0x43   :  { %v270_v26 = vmax.f32 %v206_v17, 0.0  ;;  %v107_v17 = vld [vmem:[#allocation2 + $0x160] sm:$0xff] }
  0x44   :  { %v302_v22 = vmax.f32 %v238_v13, 0.0  ;;  %v318_v23 = vmax.f32 %v254_v14, 0.0  ;;  %v286_v27 = vmax.f32 %v222_v19, 0.0  ;;  %v123_v19 = vld [vmem:[#allocation2 + $0x1e0] sm:$0xff] }
  0x46   :  { %464 = vmatmul.f32.gmra.mxu2 %v298_v20  ;;  %512 = vmatmul.f32.gmra.mxu3 %v314_v21  ;;  %v71_v20 = vld [vmem:[#allocation2 + $0x40] sm:$0xff] }
  0x47   :  { %v87_v21 = vld [vmem:[#allocation2 + $0xc0] sm:$0xff]  ;;  %v139_v28 = vmul.f32 %v840_v10, %v71_v20 }
  0x48   :  { %368 = vmatmul.f32.gmra.mxu0 %v266_v24  ;;  %416 = vmatmul.f32.gmra.mxu1 %v282_v25  ;;  %v171_v24 = vmul.f32 %v840_v10, %v103_v15  ;;  %v187_v25 = vmul.f32 %v840_v10, %v119_v16  ;;  %v155_v29 = vmul.f32 %v840_v10, %v87_v21 }
  0x49   :  { %v207_v34 = vadd.f32 %v846_v18, %v139_v28 }
  0x4a   :  { %v239_v30 = vadd.f32 %v846_v18, %v171_v24  ;;  %v255_v31 = vadd.f32 %v846_v18, %v187_v25  ;;  %v223_v35 = vadd.f32 %v846_v18, %v155_v29 }
  0x4b   :  { %v271_v42 = vmax.f32 %v207_v34, 0.0  ;;  %v108_v34 = vld [vmem:[#allocation2 + $0x168] sm:$0xff] }
  0x4c   :  { %v303_v38 = vmax.f32 %v239_v30, 0.0  ;;  %v319_v39 = vmax.f32 %v255_v31, 0.0  ;;  %v287_v43 = vmax.f32 %v223_v35, 0.0  ;;  %v124_v35 = vld [vmem:[#allocation2 + $0x1e8] sm:$0xff] }
  0x4e   :  { %467 = vmatmul.f32.gmra.mxu2 %v299_v36  ;;  %515 = vmatmul.f32.gmra.mxu3 %v315_v37  ;;  %v72_v36 = vld [vmem:[#allocation2 + $0x48] sm:$0xff] }
  0x4f   :  { %v88_v37 = vld [vmem:[#allocation2 + $0xc8] sm:$0xff]  ;;  %v140_v44 = vmul.f32 %v840_v10, %v72_v36 }
  0x50   :  { %371 = vmatmul.f32.gmra.mxu0 %v267_v40  ;;  %419 = vmatmul.f32.gmra.mxu1 %v283_v41  ;;  %v172_v40 = vmul.f32 %v840_v10, %v104_v32  ;;  %v188_v41 = vmul.f32 %v840_v10, %v120_v33  ;;  %v156_v45 = vmul.f32 %v840_v10, %v88_v37 }
  0x51   :  { %v208_v50 = vadd.f32 %v846_v18, %v140_v44 }
  0x52   :  { %v240_v46 = vadd.f32 %v846_v18, %v172_v40  ;;  %v256_v47 = vadd.f32 %v846_v18, %v188_v41  ;;  %v224_v51 = vadd.f32 %v846_v18, %v156_v45 }
  0x53   :  { %v272_v58 = vmax.f32 %v208_v50, 0.0  ;;  %v109_v50 = vld [vmem:[#allocation2 + $0x170] sm:$0xff] }
  0x54   :  { %v304_v54 = vmax.f32 %v240_v46, 0.0  ;;  %v320_v55 = vmax.f32 %v256_v47, 0.0  ;;  %v288_v59 = vmax.f32 %v224_v51, 0.0  ;;  %v125_v51 = vld [vmem:[#allocation2 + $0x1f0] sm:$0xff] }
  0x56   :  { %470 = vmatmul.f32.gmra.mxu2 %v300_v52  ;;  %518 = vmatmul.f32.gmra.mxu3 %v316_v53  ;;  %v73_v52 = vld [vmem:[#allocation2 + $0x50] sm:$0xff] }
  0x57   :  { %v89_v53 = vld [vmem:[#allocation2 + $0xd0] sm:$0xff]  ;;  %v141_v60 = vmul.f32 %v840_v10, %v73_v52 }
  0x58   :  { %374 = vmatmul.f32.gmra.mxu0 %v268_v56  ;;  %422 = vmatmul.f32.gmra.mxu1 %v284_v57  ;;  %v173_v56 = vmul.f32 %v840_v10, %v105_v48  ;;  %v189_v57 = vmul.f32 %v840_v10, %v121_v49  ;;  %v157_v61 = vmul.f32 %v840_v10, %v89_v53 }
  0x59   :  { %v209_v2 = vadd.f32 %v846_v18, %v141_v60 }
  0x5a   :  { %v241_v62 = vadd.f32 %v846_v18, %v173_v56  ;;  %v257_v63 = vadd.f32 %v846_v18, %v189_v57  ;;  %v225_v3 = vadd.f32 %v846_v18, %v157_v61 }
  0x5b   :  { %v273_v11 = vmax.f32 %v209_v2, 0.0  ;;  %v110_v2 = vld [vmem:[#allocation2 + $0x178] sm:$0xff] }
  0x5c   :  { %v305_v6 = vmax.f32 %v241_v62, 0.0  ;;  %v321_v7 = vmax.f32 %v257_v63, 0.0  ;;  %v289_v12 = vmax.f32 %v225_v3, 0.0  ;;  %v126_v3 = vld [vmem:[#allocation2 + $0x1f8] sm:$0xff] }
  0x5e   :  { %473 = vmatmul.f32.gmra.mxu2 %v301_v4  ;;  %521 = vmatmul.f32.gmra.mxu3 %v317_v5  ;;  %v74_v4 = vld [vmem:[#allocation2 + $0x58] sm:$0xff] }
  0x5f   :  { %v90_v5 = vld [vmem:[#allocation2 + $0xd8] sm:$0xff]  ;;  %v142_v13 = vmul.f32 %v840_v10, %v74_v4 }
  0x60   :  { %377 = vmatmul.f32.gmra.mxu0 %v269_v8  ;;  %425 = vmatmul.f32.gmra.mxu1 %v285_v9  ;;  %v174_v8 = vmul.f32 %v840_v10, %v106_v0  ;;  %v190_v9 = vmul.f32 %v840_v10, %v122_v1  ;;  %v158_v14 = vmul.f32 %v840_v10, %v90_v5 }
  0x61   :  { %v210_v20 = vadd.f32 %v846_v18, %v142_v13 }
  0x62   :  { %v242_v15 = vadd.f32 %v846_v18, %v174_v8  ;;  %v258_v16 = vadd.f32 %v846_v18, %v190_v9  ;;  %v226_v21 = vadd.f32 %v846_v18, %v158_v14 }
  0x63   :  { %v274_v28 = vmax.f32 %v210_v20, 0.0 }
  0x64   :  { %v306_v24 = vmax.f32 %v242_v15, 0.0  ;;  %v322_v25 = vmax.f32 %v258_v16, 0.0  ;;  %v290_v29 = vmax.f32 %v226_v21, 0.0 }
  0x66   :  { %476 = vmatmul.f32.gmra.mxu2 %v302_v22  ;;  %524 = vmatmul.f32.gmra.mxu3 %v318_v23  ;;  %v75_v22 = vld [vmem:[#allocation2 + $0x60] sm:$0xff] }
  0x67   :  { %v91_v23 = vld [vmem:[#allocation2 + $0xe0] sm:$0xff]  ;;  %v143_v30 = vmul.f32 %v840_v10, %v75_v22 }
  0x68   :  { %380 = vmatmul.f32.gmra.mxu0 %v270_v26  ;;  %428 = vmatmul.f32.gmra.mxu1 %v286_v27  ;;  %v175_v26 = vmul.f32 %v840_v10, %v107_v17  ;;  %v191_v27 = vmul.f32 %v840_v10, %v123_v19  ;;  %v159_v31 = vmul.f32 %v840_v10, %v91_v23 }
  0x69   :  { %v211_v36 = vadd.f32 %v846_v18, %v143_v30 }
  0x6a   :  { %v243_v32 = vadd.f32 %v846_v18, %v175_v26  ;;  %v259_v33 = vadd.f32 %v846_v18, %v191_v27  ;;  %v227_v37 = vadd.f32 %v846_v18, %v159_v31 }
  0x6b   :  { %v275_v44 = vmax.f32 %v211_v36, 0.0 }
  0x6c   :  { %v307_v40 = vmax.f32 %v243_v32, 0.0  ;;  %v323_v41 = vmax.f32 %v259_v33, 0.0  ;;  %v291_v45 = vmax.f32 %v227_v37, 0.0 }
  0x6e   :  { %479 = vmatmul.f32.gmra.mxu2 %v303_v38  ;;  %527 = vmatmul.f32.gmra.mxu3 %v319_v39  ;;  %v76_v38 = vld [vmem:[#allocation2 + $0x68] sm:$0xff] }
  0x6f   :  { %v92_v39 = vld [vmem:[#allocation2 + $0xe8] sm:$0xff]  ;;  %v144_v46 = vmul.f32 %v840_v10, %v76_v38 }
  0x70   :  { %383 = vmatmul.f32.gmra.mxu0 %v271_v42  ;;  %431 = vmatmul.f32.gmra.mxu1 %v287_v43  ;;  %v176_v42 = vmul.f32 %v840_v10, %v108_v34  ;;  %v192_v43 = vmul.f32 %v840_v10, %v124_v35  ;;  %v160_v47 = vmul.f32 %v840_v10, %v92_v39 }
  0x71   :  { %v212_v52 = vadd.f32 %v846_v18, %v144_v46 }
  0x72   :  { %v244_v48 = vadd.f32 %v846_v18, %v176_v42  ;;  %v260_v49 = vadd.f32 %v846_v18, %v192_v43  ;;  %v228_v53 = vadd.f32 %v846_v18, %v160_v47 }
  0x73   :  { %v276_v60 = vmax.f32 %v212_v52, 0.0 }
  0x74   :  { %v308_v56 = vmax.f32 %v244_v48, 0.0  ;;  %v324_v57 = vmax.f32 %v260_v49, 0.0  ;;  %v292_v61 = vmax.f32 %v228_v53, 0.0 }
  0x76   :  { %482 = vmatmul.f32.gmra.mxu2 %v304_v54  ;;  %530 = vmatmul.f32.gmra.mxu3 %v320_v55  ;;  %v77_v54 = vld [vmem:[#allocation2 + $0x70] sm:$0xff] }
  0x77   :  { %v93_v55 = vld [vmem:[#allocation2 + $0xf0] sm:$0xff]  ;;  %v145_v62 = vmul.f32 %v840_v10, %v77_v54 }
  0x78   :  { %386 = vmatmul.f32.gmra.mxu0 %v272_v58  ;;  %434 = vmatmul.f32.gmra.mxu1 %v288_v59  ;;  %v177_v58 = vmul.f32 %v840_v10, %v109_v50  ;;  %v193_v59 = vmul.f32 %v840_v10, %v125_v51  ;;  %v161_v63 = vmul.f32 %v840_v10, %v93_v55 }
  0x79   :  { %v213_v4 = vadd.f32 %v846_v18, %v145_v62 }
  0x7a   :  { %v245_v0 = vadd.f32 %v846_v18, %v177_v58  ;;  %v261_v1 = vadd.f32 %v846_v18, %v193_v59  ;;  %v229_v5 = vadd.f32 %v846_v18, %v161_v63 }
  0x7b   :  { %v277_v13 = vmax.f32 %v213_v4, 0.0 }
  0x7c   :  { %v309_v8 = vmax.f32 %v245_v0, 0.0  ;;  %v325_v9 = vmax.f32 %v261_v1, 0.0  ;;  %v293_v14 = vmax.f32 %v229_v5, 0.0 }
  0x7e   :  { %485 = vmatmul.f32.gmra.mxu2 %v305_v6  ;;  %533 = vmatmul.f32.gmra.mxu3 %v321_v7  ;;  %v78_v6 = vld [vmem:[#allocation2 + $0x78] sm:$0xff] }
  0x7f   :  { %v94_v7 = vld [vmem:[#allocation2 + $0xf8] sm:$0xff]  ;;  %v146_v15 = vmul.f32 %v840_v10, %v78_v6 }
  0x80   :  { %389 = vmatmul.f32.gmra.mxu0 %v273_v11  ;;  %437 = vmatmul.f32.gmra.mxu1 %v289_v12  ;;  %v178_v11 = vmul.f32 %v840_v10, %v110_v2  ;;  %v194_v12 = vmul.f32 %v840_v10, %v126_v3  ;;  %v162_v16 = vmul.f32 %v840_v10, %v94_v7 }
  0x81   :  { %v214_v20 = vadd.f32 %v846_v18, %v146_v15 }
  0x82   :  { %v246_v17 = vadd.f32 %v846_v18, %v178_v11  ;;  %v262_v19 = vadd.f32 %v846_v18, %v194_v12  ;;  %v230_v21 = vadd.f32 %v846_v18, %v162_v16 }
  0x84   :  { %v310_v22 = vmax.f32 %v246_v17, 0.0  ;;  %v326_v23 = vmax.f32 %v262_v19, 0.0 }
  0x86   :  { %488 = vmatmul.f32.gmra.mxu2 %v306_v24  ;;  %536 = vmatmul.f32.gmra.mxu3 %v322_v25  ;;  %v278_v24 = vmax.f32 %v214_v20, 0.0  ;;  %v294_v25 = vmax.f32 %v230_v21, 0.0 }
  0x88   :  { %392 = vmatmul.f32.gmra.mxu0 %v274_v28  ;;  %440 = vmatmul.f32.gmra.mxu1 %v290_v29 }
  0x8e   :  { %491 = vmatmul.f32.gmra.mxu2 %v307_v40  ;;  %539 = vmatmul.f32.gmra.mxu3 %v323_v41 }
  0x90   :  { %395 = vmatmul.f32.gmra.mxu0 %v275_v44  ;;  %443 = vmatmul.f32.gmra.mxu1 %v291_v45 }
  0x96   :  { %494 = vmatmul.f32.gmra.mxu2 %v308_v56  ;;  %542 = vmatmul.f32.gmra.mxu3 %v324_v57 }
  0x98   :  { %398 = vmatmul.f32.gmra.mxu0 %v276_v60  ;;  %446 = vmatmul.f32.gmra.mxu1 %v292_v61 }
  0x9e   :  { %497 = vmatmul.f32.gmra.mxu2 %v309_v8  ;;  %545 = vmatmul.f32.gmra.mxu3 %v325_v9 }
  0xa0   :  { %401 = vmatmul.f32.gmra.mxu0 %v277_v13  ;;  %449 = vmatmul.f32.gmra.mxu1 %v293_v14 }
  0xa6   :  { %500 = vmatmul.f32.gmra.mxu2 %v310_v22  ;;  %548 = vmatmul.f32.gmra.mxu3 %v326_v23 }
  0xa8   :  { %404 = vmatmul.f32.gmra.mxu0 %v278_v24  ;;  %452 = vmatmul.f32.gmra.mxu1 %v294_v25 }
  0xad   :  { %v360_v10 = vpop.f32.mrf.mxu0  ;;  %v408_v26 = vpop.f32.mrf.mxu1 }
  0xae   :  { %552 = vst [vmem:[#allocation8] sm:$0xff] %v360_v10 }
  0xaf   :  { %568 = vst [vmem:[#allocation8 + $0x80] sm:$0xff] %v408_v26 }
  0xb1   :  { %v456_v27 = vpop.f32.mrf.mxu2  ;;  %v504_v28 = vpop.f32.mrf.mxu3 }
  0xb2   :  { %584 = vst [vmem:[#allocation8 + $0x100] sm:$0xff] %v456_v27 }
  0xb3   :  { %600 = vst [vmem:[#allocation8 + $0x180] sm:$0xff] %v504_v28 }
  0xb5   :  { %v363_v29 = vpop.f32.mrf.mxu0  ;;  %v411_v30 = vpop.f32.mrf.mxu1 }
  0xb6   :  { %553 = vst [vmem:[#allocation8 + $0x8] sm:$0xff] %v363_v29 }
  0xb7   :  { %569 = vst [vmem:[#allocation8 + $0x88] sm:$0xff] %v411_v30 }
  0xb9   :  { %v459_v18 = vpop.f32.mrf.mxu2  ;;  %v507_v31 = vpop.f32.mrf.mxu3 }
  0xba   :  { %585 = vst [vmem:[#allocation8 + $0x108] sm:$0xff] %v459_v18 }
  0xbb   :  { %601 = vst [vmem:[#allocation8 + $0x188] sm:$0xff] %v507_v31 }
  0xbd   :  { %v366_v32 = vpop.f32.mrf.mxu0  ;;  %v414_v33 = vpop.f32.mrf.mxu1 }
  0xbe   :  { %554 = vst [vmem:[#allocation8 + $0x10] sm:$0xff] %v366_v32 }
  0xbf   :  { %570 = vst [vmem:[#allocation8 + $0x90] sm:$0xff] %v414_v33 }
  0xc1   :  { %v462_v34 = vpop.f32.mrf.mxu2  ;;  %v510_v35 = vpop.f32.mrf.mxu3 }
  0xc2   :  { %586 = vst [vmem:[#allocation8 + $0x110] sm:$0xff] %v462_v34 }
  0xc3   :  { %602 = vst [vmem:[#allocation8 + $0x190] sm:$0xff] %v510_v35 }
  0xc5   :  { %v369_v36 = vpop.f32.mrf.mxu0  ;;  %v417_v37 = vpop.f32.mrf.mxu1 }
  0xc6   :  { %555 = vst [vmem:[#allocation8 + $0x18] sm:$0xff] %v369_v36 }
  0xc7   :  { %571 = vst [vmem:[#allocation8 + $0x98] sm:$0xff] %v417_v37 }
  0xc9   :  { %v465_v38 = vpop.f32.mrf.mxu2  ;;  %v513_v39 = vpop.f32.mrf.mxu3 }
  0xca   :  { %587 = vst [vmem:[#allocation8 + $0x118] sm:$0xff] %v465_v38 }
  0xcb   :  { %603 = vst [vmem:[#allocation8 + $0x198] sm:$0xff] %v513_v39 }
  0xcd   :  { %v372_v40 = vpop.f32.mrf.mxu0  ;;  %v420_v41 = vpop.f32.mrf.mxu1 }
  0xce   :  { %556 = vst [vmem:[#allocation8 + $0x20] sm:$0xff] %v372_v40 }
  0xcf   :  { %572 = vst [vmem:[#allocation8 + $0xa0] sm:$0xff] %v420_v41 }
  0xd1   :  { %v468_v42 = vpop.f32.mrf.mxu2  ;;  %v516_v43 = vpop.f32.mrf.mxu3 }
  0xd2   :  { %588 = vst [vmem:[#allocation8 + $0x120] sm:$0xff] %v468_v42 }
  0xd3   :  { %604 = vst [vmem:[#allocation8 + $0x1a0] sm:$0xff] %v516_v43 }
  0xd5   :  { %v375_v44 = vpop.f32.mrf.mxu0  ;;  %v423_v45 = vpop.f32.mrf.mxu1 }
  0xd6   :  { %557 = vst [vmem:[#allocation8 + $0x28] sm:$0xff] %v375_v44 }
  0xd7   :  { %573 = vst [vmem:[#allocation8 + $0xa8] sm:$0xff] %v423_v45 }
  0xd9   :  { %v471_v46 = vpop.f32.mrf.mxu2  ;;  %v519_v47 = vpop.f32.mrf.mxu3 }
  0xda   :  { %589 = vst [vmem:[#allocation8 + $0x128] sm:$0xff] %v471_v46 }
  0xdb   :  { %605 = vst [vmem:[#allocation8 + $0x1a8] sm:$0xff] %v519_v47 }
  0xdd   :  { %v378_v48 = vpop.f32.mrf.mxu0  ;;  %v426_v49 = vpop.f32.mrf.mxu1 }
  0xde   :  { %558 = vst [vmem:[#allocation8 + $0x30] sm:$0xff] %v378_v48 }
  0xdf   :  { %574 = vst [vmem:[#allocation8 + $0xb0] sm:$0xff] %v426_v49 }
  0xe1   :  { %v474_v50 = vpop.f32.mrf.mxu2  ;;  %v522_v51 = vpop.f32.mrf.mxu3 }
  0xe2   :  { %590 = vst [vmem:[#allocation8 + $0x130] sm:$0xff] %v474_v50 }
  0xe3   :  { %606 = vst [vmem:[#allocation8 + $0x1b0] sm:$0xff] %v522_v51 }
  0xe5   :  { %v381_v52 = vpop.f32.mrf.mxu0  ;;  %v429_v53 = vpop.f32.mrf.mxu1 }
  0xe6   :  { %559 = vst [vmem:[#allocation8 + $0x38] sm:$0xff] %v381_v52 }
  0xe7   :  { %575 = vst [vmem:[#allocation8 + $0xb8] sm:$0xff] %v429_v53 }
  0xe9   :  { %v477_v54 = vpop.f32.mrf.mxu2  ;;  %v525_v55 = vpop.f32.mrf.mxu3 }
  0xea   :  { %591 = vst [vmem:[#allocation8 + $0x138] sm:$0xff] %v477_v54 }
  0xeb   :  { %607 = vst [vmem:[#allocation8 + $0x1b8] sm:$0xff] %v525_v55 }
  0xed   :  { %v384_v56 = vpop.f32.mrf.mxu0  ;;  %v432_v57 = vpop.f32.mrf.mxu1 }
  0xee   :  { %560 = vst [vmem:[#allocation8 + $0x40] sm:$0xff] %v384_v56 }
  0xef   :  { %576 = vst [vmem:[#allocation8 + $0xc0] sm:$0xff] %v432_v57 }
  0xf1   :  { %v480_v58 = vpop.f32.mrf.mxu2  ;;  %v528_v59 = vpop.f32.mrf.mxu3 }
  0xf2   :  { %592 = vst [vmem:[#allocation8 + $0x140] sm:$0xff] %v480_v58 }
  0xf3   :  { %608 = vst [vmem:[#allocation8 + $0x1c0] sm:$0xff] %v528_v59 }
  0xf5   :  { %v387_v60 = vpop.f32.mrf.mxu0  ;;  %v435_v61 = vpop.f32.mrf.mxu1 }
  0xf6   :  { %561 = vst [vmem:[#allocation8 + $0x48] sm:$0xff] %v387_v60 }
  0xf7   :  { %577 = vst [vmem:[#allocation8 + $0xc8] sm:$0xff] %v435_v61 }
  0xf9   :  { %v483_v62 = vpop.f32.mrf.mxu2  ;;  %v531_v63 = vpop.f32.mrf.mxu3 }
  0xfa   :  { %593 = vst [vmem:[#allocation8 + $0x148] sm:$0xff] %v483_v62 }
  0xfb   :  { %609 = vst [vmem:[#allocation8 + $0x1c8] sm:$0xff] %v531_v63 }
  0xfd   :  { %v390_v0 = vpop.f32.mrf.mxu0  ;;  %v438_v1 = vpop.f32.mrf.mxu1 }
  0xfe   :  { %562 = vst [vmem:[#allocation8 + $0x50] sm:$0xff] %v390_v0 }
  0xff   :  { %578 = vst [vmem:[#allocation8 + $0xd0] sm:$0xff] %v438_v1 }
 0x101   :  { %v486_v2 = vpop.f32.mrf.mxu2  ;;  %v534_v3 = vpop.f32.mrf.mxu3 }
 0x102   :  { %594 = vst [vmem:[#allocation8 + $0x150] sm:$0xff] %v486_v2 }
 0x103   :  { %610 = vst [vmem:[#allocation8 + $0x1d0] sm:$0xff] %v534_v3 }
 0x105   :  { %v393_v4 = vpop.f32.mrf.mxu0  ;;  %v441_v5 = vpop.f32.mrf.mxu1 }
 0x106   :  { %563 = vst [vmem:[#allocation8 + $0x58] sm:$0xff] %v393_v4 }
 0x107   :  { %579 = vst [vmem:[#allocation8 + $0xd8] sm:$0xff] %v441_v5 }
 0x109   :  { %v489_v6 = vpop.f32.mrf.mxu2  ;;  %v537_v7 = vpop.f32.mrf.mxu3 }
 0x10a   :  { %595 = vst [vmem:[#allocation8 + $0x158] sm:$0xff] %v489_v6 }
 0x10b   :  { %611 = vst [vmem:[#allocation8 + $0x1d8] sm:$0xff] %v537_v7 }
 0x10d   :  { %v396_v8 = vpop.f32.mrf.mxu0  ;;  %v444_v9 = vpop.f32.mrf.mxu1 }
 0x10e   :  { %564 = vst [vmem:[#allocation8 + $0x60] sm:$0xff] %v396_v8 }
 0x10f   :  { %580 = vst [vmem:[#allocation8 + $0xe0] sm:$0xff] %v444_v9 }
 0x111   :  { %v492_v11 = vpop.f32.mrf.mxu2  ;;  %v540_v12 = vpop.f32.mrf.mxu3 }
 0x112   :  { %596 = vst [vmem:[#allocation8 + $0x160] sm:$0xff] %v492_v11 }
 0x113   :  { %612 = vst [vmem:[#allocation8 + $0x1e0] sm:$0xff] %v540_v12 }
 0x115   :  { %v399_v13 = vpop.f32.mrf.mxu0  ;;  %v447_v14 = vpop.f32.mrf.mxu1 }
 0x116   :  { %565 = vst [vmem:[#allocation8 + $0x68] sm:$0xff] %v399_v13 }
 0x117   :  { %581 = vst [vmem:[#allocation8 + $0xe8] sm:$0xff] %v447_v14 }
 0x119   :  { %v495_v15 = vpop.f32.mrf.mxu2  ;;  %v543_v16 = vpop.f32.mrf.mxu3 }
 0x11a   :  { %597 = vst [vmem:[#allocation8 + $0x168] sm:$0xff] %v495_v15 }
 0x11b   :  { %613 = vst [vmem:[#allocation8 + $0x1e8] sm:$0xff] %v543_v16 }
 0x11d   :  { %v402_v17 = vpop.f32.mrf.mxu0  ;;  %v450_v19 = vpop.f32.mrf.mxu1 }
 0x11e   :  { %566 = vst [vmem:[#allocation8 + $0x70] sm:$0xff] %v402_v17 }
 0x11f   :  { %582 = vst [vmem:[#allocation8 + $0xf0] sm:$0xff] %v450_v19 }
 0x121   :  { %v498_v20 = vpop.f32.mrf.mxu2  ;;  %v546_v21 = vpop.f32.mrf.mxu3 }
 0x122   :  { %598 = vst [vmem:[#allocation8 + $0x170] sm:$0xff] %v498_v20 }
 0x123   :  { %614 = vst [vmem:[#allocation8 + $0x1f0] sm:$0xff] %v546_v21 }
 0x125   :  { %v405_v22 = vpop.f32.mrf.mxu0  ;;  %v453_v23 = vpop.f32.mrf.mxu1 }
 0x126   :  { %567 = vst [vmem:[#allocation8 + $0x78] sm:$0xff] %v405_v22 }
 0x127   :  { %583 = vst [vmem:[#allocation8 + $0xf8] sm:$0xff] %v453_v23 }
 0x129   :  { %v501_v24 = vpop.f32.mrf.mxu2  ;;  %v549_v25 = vpop.f32.mrf.mxu3 }
 0x12a   :  { %599 = vst [vmem:[#allocation8 + $0x178] sm:$0xff] %v501_v24 }
 0x12b   :  { %615 = vst [vmem:[#allocation8 + $0x1f8] sm:$0xff] %v549_v25 }
 0x12c   :  { %628 = dma.vmem_to_hbm [thread:$0]  %s621_s5, 8192, %s623_s8, [#allocation4], %s796_s25, %s796_s25, %s797_s26  }
 0x12d   :  { %792 = dma.done.wait [#allocation4], 8192  }
 0x12e   :  { %793 = vsyncadd [#allocation4], 4294959104 }
 0x12f   :  { %633 = vsyncpa [#allocation3], 1 }
 0x130   :  { %634 = vsyncpa [#allocation6], 1 }
 0x131   :  { %635 = vsyncpa [#allocation4], 1 }

</bundles_post_ra>
